<compile_context>
chip_gen: v6e
topology: v6e:2x2x1
jax: 0.10.0
libtpu: 0.0.40
codegen_flags: <defaults>
</compile_context>

<pallas_src>
import functools

import jax
import jax.numpy as jnp
from jax.experimental import pallas as pl
from jax.experimental.pallas import tpu as pltpu

HIDDEN = 64
FUSED = 2 * HIDDEN  # 128: exactly one 128-lane vreg / native MXU tile width


def _round_up(x, m):
    return (x + m - 1) // m * m


# --------------------------------------------------------------------------
# Kernel: one batch tile per grid step, full fused twin-Q MLP in VMEM.
# --------------------------------------------------------------------------
def critic_kernel(s_ref, a_ref,
                  w1s_ref, w1a_ref, b1_ref,
                  w2_ref, b2_ref,
                  w3_ref, b3_ref,
                  q_ref):
    wdt = w1s_ref.dtype  # compute dtype of the MXU operands (bf16 or f32)

    s = s_ref[...].astype(wdt)
    a = a_ref[...].astype(wdt)

    # Layer 1 (concat fused into two partial matmuls): x@W1 = s@W1s + a@W1a.
    h = jnp.dot(s, w1s_ref[...], preferred_element_type=jnp.float32)
    h = h + jnp.dot(a, w1a_ref[...], preferred_element_type=jnp.float32)
    h = jnp.maximum(h + b1_ref[...], 0.0)          # bias/ReLU in f32 (VPU)

    # Layer 2 (block-diagonal: q1 and q2 hidden layers side by side).
    h = jnp.dot(h.astype(wdt), w2_ref[...], preferred_element_type=jnp.float32)
    h = jnp.maximum(h + b2_ref[...], 0.0)

    # Layer 3 on VPU/XLU instead of an N=2 MXU matmul: multiply the (bt,128)
    # activations by the packed (1,128) head weights, then reduce each
    # 64-lane half with a masked lane-sum (MXU slot stays free).
    prod = h * w3_ref[...]                                        # f32, VPU
    lane = jax.lax.broadcasted_iota(jnp.int32, prod.shape, dimension=1)
    q1 = jnp.sum(jnp.where(lane < HIDDEN, prod, 0.0), axis=-1, keepdims=True)
    q2 = jnp.sum(jnp.where(lane >= HIDDEN, prod, 0.0), axis=-1, keepdims=True)
    q = jnp.concatenate([q1, q2], axis=-1) + b3_ref[...]
    q_ref[...] = q.astype(q_ref.dtype)


# --------------------------------------------------------------------------
# Parameter packing (done once, outside the hot path).
# --------------------------------------------------------------------------
def pack_critic_params(params, state_dim, compute_dtype=jnp.bfloat16):
    """Pack raw twin-head params into fused 128-lane-wide matrices.

    compute_dtype: dtype of the matmul operands.  bf16 is valid on v5e/v6e/
    v7x (the MXU takes bf16 natively on all of them) and halves weight DMA;
    biases and the layer-3 head stay f32 and accumulation is always f32.
    """
    # W1: (in, 128) = [q1_w1 | q2_w1], split by input rows (state / action).
    w1 = jnp.concatenate([params["q1_w1"], params["q2_w1"]], axis=1)
    w1s = w1[:state_dim]
    w1a = w1[state_dim:]
    b1 = jnp.concatenate([params["q1_b1"], params["q2_b1"]], axis=1)  # (1,128)

    # W2: block-diagonal (128, 128).
    w2 = jnp.zeros((FUSED, FUSED), jnp.float32)
    w2 = w2.at[:HIDDEN, :HIDDEN].set(params["q1_w2"])
    w2 = w2.at[HIDDEN:, HIDDEN:].set(params["q2_w2"])
    b2 = jnp.concatenate([params["q1_b2"], params["q2_b2"]], axis=1)  # (1,128)

    # W3: packed as a single (1, 128) row (lanes 0..63 = q1 head, 64..127 =
    # q2 head) consumed by the in-kernel VPU/XLU reduction.  Kept in f32.
    w3 = jnp.concatenate([params["q1_w3"].reshape(1, HIDDEN),
                          params["q2_w3"].reshape(1, HIDDEN)], axis=1)
    b3 = jnp.concatenate([params["q1_b3"], params["q2_b3"]], axis=1)  # (1,2)

    cd = compute_dtype
    return {
        "w1s": w1s.astype(cd), "w1a": w1a.astype(cd), "b1": b1.astype(jnp.float32),
        "w2": w2.astype(cd), "b2": b2.astype(jnp.float32),
        "w3": w3.astype(jnp.float32), "b3": b3.astype(jnp.float32),
    }


def _choose_bt(B, block_b, min_itemsize):
    """Batch tile: sublane-aligned, capped by block_b, >= 2 grid steps when
    possible so both v7x TensorCores get work (no-op on v5e/v6e)."""
    align = 8 * max(1, 4 // max(1, min_itemsize))  # 8 for f32, 16 for bf16
    if B <= align:
        return B                      # single full-extent block, no constraint
    target = min(block_b, pl.cdiv(B, 2))
    return max(align, _round_up(target, align))


# --------------------------------------------------------------------------
# Wrapper: batch grid, VMEM-resident weights, fused (B, 2) output.
# --------------------------------------------------------------------------
@functools.partial(jax.jit, static_argnames=("block_b",))
def critic_forward(state, action, packed, *, block_b=4096):
    B, ds = state.shape
    _, da = action.shape

    min_itemsize = min(state.dtype.itemsize, action.dtype.itemsize)
    bt = _choose_bt(B, block_b, min_itemsize)
    grid = (pl.cdiv(B, bt),)          # ragged last block handled by Pallas

    batch_map = lambda i: (i, 0)
    const_map = lambda i: (0, 0)      # weights/biases: same block every step

    in_specs = [
        pl.BlockSpec((bt, ds), batch_map),
        pl.BlockSpec((bt, da), batch_map),
        pl.BlockSpec(packed["w1s"].shape, const_map),
        pl.BlockSpec(packed["w1a"].shape, const_map),
        pl.BlockSpec(packed["b1"].shape, const_map),
        pl.BlockSpec(packed["w2"].shape, const_map),
        pl.BlockSpec(packed["b2"].shape, const_map),
        pl.BlockSpec(packed["w3"].shape, const_map),
        pl.BlockSpec(packed["b3"].shape, const_map),
    ]
    out_spec = pl.BlockSpec((bt, 2), batch_map)

    # VMEM budget: double-buffered input/output tiles + resident weights +
    # f32 layer intermediates, plus headroom.  Kept well under v7x's 64 MiB.
    w_bytes = sum(int(v.size) * v.dtype.itemsize for v in packed.values())
    step_bytes = (2 * bt * (ds * state.dtype.itemsize + da * action.dtype.itemsize)
                  + 2 * bt * 2 * 4 + w_bytes + 2 * bt * FUSED * 4)
    vmem_limit = int(min(max(step_bytes + (4 << 20), 16 << 20), 32 << 20))

    # Advisory cost estimate so XLA overlaps this tiny kernel correctly.
    flops = 2 * B * ((ds + da) * FUSED + FUSED * FUSED) + 3 * B * FUSED
    bytes_accessed = (B * (ds * state.dtype.itemsize + da * action.dtype.itemsize)
                      + B * 2 * 4 + w_bytes)

    q = pl.pallas_call(
        critic_kernel,
        out_shape=jax.ShapeDtypeStruct((B, 2), jnp.float32),
        grid=grid,
        in_specs=in_specs,
        out_specs=out_spec,
        compiler_params=pltpu.CompilerParams(
            dimension_semantics=("parallel",),
            vmem_limit_bytes=vmem_limit),
        cost_estimate=pl.CostEstimate(
            flops=flops, transcendentals=0, bytes_accessed=bytes_accessed),
    )(state, action,
      packed["w1s"], packed["w1a"], packed["b1"],
      packed["w2"], packed["b2"],
      packed["w3"], packed["b3"])

    return q[:, 0:1], q[:, 1:2]


# --------------------------------------------------------------------------
# Reference + init (PyTorch nn.Linear-style init, weights stored (in, out)).
# --------------------------------------------------------------------------
def init_params(key, state_dim, action_dim, hidden=HIDDEN):
    dims = [
        ("q1_w1", "q1_b1", state_dim + action_dim, hidden),
        ("q1_w2", "q1_b2", hidden, hidden),
        ("q1_w3", "q1_b3", hidden, 1),
        ("q2_w1", "q2_b1", state_dim + action_dim, hidden),
        ("q2_w2", "q2_b2", hidden, hidden),
        ("q2_w3", "q2_b3", hidden, 1),
    ]
    params = {}
    for wname, bname, fan_in, fan_out in dims:
        key, kw, kb = jax.random.split(key, 3)
        bound = 1.0 / jnp.sqrt(fan_in)
        params[wname] = jax.random.uniform(kw, (fan_in, fan_out), jnp.float32,
                                           -bound, bound)
        params[bname] = jax.random.uniform(kb, (1, fan_out), jnp.float32,
                                           -bound, bound)
    return params


def critic_forward_ref(state, action, params):
    x = jnp.concatenate([state, action], axis=1)
    h1 = jax.nn.relu(x @ params["q1_w1"] + params["q1_b1"])
    h1 = jax.nn.relu(h1 @ params["q1_w2"] + params["q1_b2"])
    q1 = h1 @ params["q1_w3"] + params["q1_b3"]
    h2 = jax.nn.relu(x @ params["q2_w1"] + params["q2_b1"])
    h2 = jax.nn.relu(h2 @ params["q2_w2"] + params["q2_b2"])
    q2 = h2 @ params["q2_w3"] + params["q2_b3"]
    return q1, q2


if __name__ == "__main__":
    state_dim, action_dim, batch = 16, 4, 8

    key = jax.random.PRNGKey(0)
    key, ks, ka, kp = jax.random.split(key, 4)
    state = jax.random.normal(ks, (batch, state_dim), jnp.float32)
    action = jax.random.normal(ka, (batch, action_dim), jnp.float32)
    params = init_params(kp, state_dim, action_dim)

    q1_ref, q2_ref = critic_forward_ref(state, action, params)

    # 1) f32 compute path: exact comparison against the f32 reference.
    packed_f32 = pack_critic_params(params, state_dim, compute_dtype=jnp.float32)
    q1, q2 = critic_forward(state, action, packed_f32)
    q1 = jax.block_until_ready(q1)
    q2 = jax.block_until_ready(q2)
    assert q1.shape == (batch, 1) and q2.shape == (batch, 1)
    assert jnp.allclose(q1, q1_ref, atol=1e-5, rtol=1e-5)
    assert jnp.allclose(q2, q2_ref, atol=1e-5, rtol=1e-5)

    # 2) Ragged batch with a multi-step grid (no wrapper padding; Pallas
    #    masks the partial last block).
    key, ks2, ka2 = jax.random.split(key, 3)
    b2 = 37
    state2 = jax.random.normal(ks2, (b2, state_dim), jnp.float32)
    action2 = jax.random.normal(ka2, (b2, action_dim), jnp.float32)
    q1b, q2b = critic_forward(state2, action2, packed_f32, block_b=16)
    q1b = jax.block_until_ready(q1b)
    q2b = jax.block_until_ready(q2b)
    q1b_ref, q2b_ref = critic_forward_ref(state2, action2, params)
    assert q1b.shape == (b2, 1) and q2b.shape == (b2, 1)
    assert jnp.allclose(q1b, q1b_ref, atol=1e-5, rtol=1e-5)
    assert jnp.allclose(q2b, q2b_ref, atol=1e-5, rtol=1e-5)

    # 3) Default bf16-operand path (f32 accumulation), relaxed tolerance.
    packed_bf16 = pack_critic_params(params, state_dim)  # default bf16
    q1c, q2c = critic_forward(state2, action2, packed_bf16)
    q1c = jax.block_until_ready(q1c)
    q2c = jax.block_until_ready(q2c)
    assert jnp.allclose(q1c, q1b_ref, atol=1e-1, rtol=1e-1)
    assert jnp.allclose(q2c, q2b_ref, atol=1e-1, rtol=1e-1)

    print("KERNEL_OK")
</pallas_src>

<mosaic_0001>
module attributes {stable_mosaic.version = 11 : i64} {
  func.func @critic_kernel(%arg0: i32, %arg1: memref<8x16xf32, #tpu.memory_space<vmem>>, %arg2: memref<8x4xf32, #tpu.memory_space<vmem>>, %arg3: memref<16x128xf32, #tpu.memory_space<vmem>>, %arg4: memref<4x128xf32, #tpu.memory_space<vmem>>, %arg5: memref<1x128xf32, #tpu.memory_space<vmem>>, %arg6: memref<128x128xf32, #tpu.memory_space<vmem>>, %arg7: memref<1x128xf32, #tpu.memory_space<vmem>>, %arg8: memref<1x128xf32, #tpu.memory_space<vmem>>, %arg9: memref<1x2xf32, #tpu.memory_space<vmem>>, %arg10: memref<8x2xf32, #tpu.memory_space<vmem>>) attributes {dimension_semantics = [#tpu.dimension_semantics<parallel>], iteration_bounds = array<i64: 1>, scalar_prefetch = 0 : i64, scratch_operands = 0 : i64, tpu.core_type = #tpu.core_type<tc>, window_params = [{transform_indices = @transform_0, window_bounds = array<i64: 8, 16>}, {transform_indices = @transform_1, window_bounds = array<i64: 8, 4>}, {pipeline_mode = #tpu.pipeline_mode<synchronous>, transform_indices = @transform_2, window_bounds = array<i64: 16, 128>}, {pipeline_mode = #tpu.pipeline_mode<synchronous>, transform_indices = @transform_3, window_bounds = array<i64: 4, 128>}, {pipeline_mode = #tpu.pipeline_mode<synchronous>, transform_indices = @transform_4, window_bounds = array<i64: 1, 128>}, {pipeline_mode = #tpu.pipeline_mode<synchronous>, transform_indices = @transform_5, window_bounds = array<i64: 128, 128>}, {pipeline_mode = #tpu.pipeline_mode<synchronous>, transform_indices = @transform_6, window_bounds = array<i64: 1, 128>}, {pipeline_mode = #tpu.pipeline_mode<synchronous>, transform_indices = @transform_7, window_bounds = array<i64: 1, 128>}, {pipeline_mode = #tpu.pipeline_mode<synchronous>, transform_indices = @transform_8, window_bounds = array<i64: 1, 2>}, {transform_indices = @transform_9, window_bounds = array<i64: 8, 2>}]} {
    %c0 = arith.constant 0 : index
    %c0_0 = arith.constant 0 : index
    %0 = vector.load %arg1[%c0, %c0_0] : memref<8x16xf32, #tpu.memory_space<vmem>>, vector<8x16xf32>
    %c0_1 = arith.constant 0 : index
    %c0_2 = arith.constant 0 : index
    %1 = vector.load %arg2[%c0_1, %c0_2] : memref<8x4xf32, #tpu.memory_space<vmem>>, vector<8x4xf32>
    %c0_3 = arith.constant 0 : index
    %c0_4 = arith.constant 0 : index
    %2 = vector.load %arg3[%c0_3, %c0_4] : memref<16x128xf32, #tpu.memory_space<vmem>>, vector<16x128xf32>
    %cst = arith.constant dense<0.000000e+00> : vector<8x128xf32>
    %3 = tpu.matmul %0, %2, %cst {dimension_numbers = #tpu.dot_dimension_numbers<[1], [0], [0], [1], [0, 0, 1, 1], [], []>} : vector<8x16xf32>, vector<16x128xf32>, vector<8x128xf32> -> vector<8x128xf32>
    %c0_5 = arith.constant 0 : index
    %c0_6 = arith.constant 0 : index
    %4 = vector.load %arg4[%c0_5, %c0_6] : memref<4x128xf32, #tpu.memory_space<vmem>>, vector<4x128xf32>
    %cst_7 = arith.constant dense<0.000000e+00> : vector<8x128xf32>
    %5 = tpu.matmul %1, %4, %cst_7 {dimension_numbers = #tpu.dot_dimension_numbers<[1], [0], [0], [1], [0, 0, 1, 1], [], []>} : vector<8x4xf32>, vector<4x128xf32>, vector<8x128xf32> -> vector<8x128xf32>
    %6 = arith.addf %3, %5 : vector<8x128xf32>
    %c0_8 = arith.constant 0 : index
    %c0_9 = arith.constant 0 : index
    %7 = vector.load %arg5[%c0_8, %c0_9] : memref<1x128xf32, #tpu.memory_space<vmem>>, vector<1x128xf32>
    %8 = vector.broadcast %7 : vector<1x128xf32> to vector<8x128xf32>
    %9 = arith.addf %6, %8 : vector<8x128xf32>
    %cst_10 = arith.constant 0.000000e+00 : f32
    %10 = vector.broadcast %cst_10 : f32 to vector<8x128xf32>
    %11 = arith.maximumf %9, %10 : vector<8x128xf32>
    %c0_11 = arith.constant 0 : index
    %c0_12 = arith.constant 0 : index
    %12 = vector.load %arg6[%c0_11, %c0_12] : memref<128x128xf32, #tpu.memory_space<vmem>>, vector<128x128xf32>
    %cst_13 = arith.constant dense<0.000000e+00> : vector<8x128xf32>
    %13 = tpu.matmul %11, %12, %cst_13 {dimension_numbers = #tpu.dot_dimension_numbers<[1], [0], [0], [1], [0, 0, 1, 1], [], []>} : vector<8x128xf32>, vector<128x128xf32>, vector<8x128xf32> -> vector<8x128xf32>
    %c0_14 = arith.constant 0 : index
    %c0_15 = arith.constant 0 : index
    %14 = vector.load %arg7[%c0_14, %c0_15] : memref<1x128xf32, #tpu.memory_space<vmem>>, vector<1x128xf32>
    %15 = vector.broadcast %14 : vector<1x128xf32> to vector<8x128xf32>
    %16 = arith.addf %13, %15 : vector<8x128xf32>
    %cst_16 = arith.constant 0.000000e+00 : f32
    %17 = vector.broadcast %cst_16 : f32 to vector<8x128xf32>
    %18 = arith.maximumf %16, %17 : vector<8x128xf32>
    %c0_17 = arith.constant 0 : index
    %c0_18 = arith.constant 0 : index
    %19 = vector.load %arg8[%c0_17, %c0_18] : memref<1x128xf32, #tpu.memory_space<vmem>>, vector<1x128xf32>
    %20 = vector.broadcast %19 : vector<1x128xf32> to vector<8x128xf32>
    %21 = arith.mulf %18, %20 : vector<8x128xf32>
    %22 = tpu.iota {dimensions = array<i32: 1>} : vector<8x128xi32>
    %c64_i32 = arith.constant 64 : i32
    %23 = vector.broadcast %c64_i32 : i32 to vector<8x128xi32>
    %24 = arith.cmpi slt, %22, %23 : vector<8x128xi32>
    %cst_19 = arith.constant 0.000000e+00 : f32
    %25 = vector.broadcast %cst_19 : f32 to vector<8x128xf32>
    %26 = arith.select %24, %21, %25 : vector<8x128xi1>, vector<8x128xf32>
    %cst_20 = arith.constant dense<0.000000e+00> : vector<8xf32>
    %27 = vector.multi_reduction <add>, %26, %cst_20 [1] : vector<8x128xf32> to vector<8xf32>
    %28 = vector.shape_cast %27 : vector<8xf32> to vector<8x1xf32>
    %c64_i32_21 = arith.constant 64 : i32
    %29 = vector.broadcast %c64_i32_21 : i32 to vector<8x128xi32>
    %30 = arith.cmpi sge, %22, %29 : vector<8x128xi32>
    %cst_22 = arith.constant 0.000000e+00 : f32
    %31 = vector.broadcast %cst_22 : f32 to vector<8x128xf32>
    %32 = arith.select %30, %21, %31 : vector<8x128xi1>, vector<8x128xf32>
    %cst_23 = arith.constant dense<0.000000e+00> : vector<8xf32>
    %33 = vector.multi_reduction <add>, %32, %cst_23 [1] : vector<8x128xf32> to vector<8xf32>
    %34 = vector.shape_cast %33 : vector<8xf32> to vector<8x1xf32>
    %35 = tpu.concatenate %28, %34 in 1 : vector<8x1xf32>, vector<8x1xf32> -> vector<8x2xf32>
    %c0_24 = arith.constant 0 : index
    %c0_25 = arith.constant 0 : index
    %36 = vector.load %arg9[%c0_24, %c0_25] : memref<1x2xf32, #tpu.memory_space<vmem>>, vector<1x2xf32>
    %37 = vector.broadcast %36 : vector<1x2xf32> to vector<8x2xf32>
    %38 = arith.addf %35, %37 : vector<8x2xf32>
    %c0_26 = arith.constant 0 : index
    %c0_27 = arith.constant 0 : index
    %39 = vector.load %arg10[%c0_26, %c0_27] : memref<8x2xf32, #tpu.memory_space<vmem>>, vector<8x2xf32>
    tpu.vector_store %arg10[%c0_26, %c0_27], %38 {strides = array<i32>} : memref<8x2xf32, #tpu.memory_space<vmem>>, vector<8x2xf32>,
    return
  }
  func.func @transform_0(%arg0: i32) -> (i32, i32) {
    %c0_i32 = arith.constant 0 : i32
    %c0_i32_0 = arith.constant 0 : i32
    return %arg0, %c0_i32 : i32, i32
  }
  func.func @transform_1(%arg0: i32) -> (i32, i32) {
    %c0_i32 = arith.constant 0 : i32
    %c0_i32_0 = arith.constant 0 : i32
    return %arg0, %c0_i32 : i32, i32
  }
  func.func @transform_2(%arg0: i32) -> (i32, i32) {
    %c0_i32 = arith.constant 0 : i32
    %c0_i32_0 = arith.constant 0 : i32
    %c0_i32_1 = arith.constant 0 : i32
    return %c0_i32, %c0_i32_0 : i32, i32
  }
  func.func @transform_3(%arg0: i32) -> (i32, i32) {
    %c0_i32 = arith.constant 0 : i32
    %c0_i32_0 = arith.constant 0 : i32
    %c0_i32_1 = arith.constant 0 : i32
    return %c0_i32, %c0_i32_0 : i32, i32
  }
  func.func @transform_4(%arg0: i32) -> (i32, i32) {
    %c0_i32 = arith.constant 0 : i32
    %c0_i32_0 = arith.constant 0 : i32
    %c0_i32_1 = arith.constant 0 : i32
    return %c0_i32, %c0_i32_0 : i32, i32
  }
  func.func @transform_5(%arg0: i32) -> (i32, i32) {
    %c0_i32 = arith.constant 0 : i32
    %c0_i32_0 = arith.constant 0 : i32
    %c0_i32_1 = arith.constant 0 : i32
    return %c0_i32, %c0_i32_0 : i32, i32
  }
  func.func @transform_6(%arg0: i32) -> (i32, i32) {
    %c0_i32 = arith.constant 0 : i32
    %c0_i32_0 = arith.constant 0 : i32
    %c0_i32_1 = arith.constant 0 : i32
    return %c0_i32, %c0_i32_0 : i32, i32
  }
  func.func @transform_7(%arg0: i32) -> (i32, i32) {
    %c0_i32 = arith.constant 0 : i32
    %c0_i32_0 = arith.constant 0 : i32
    %c0_i32_1 = arith.constant 0 : i32
    return %c0_i32, %c0_i32_0 : i32, i32
  }
  func.func @transform_8(%arg0: i32) -> (i32, i32) {
    %c0_i32 = arith.constant 0 : i32
    %c0_i32_0 = arith.constant 0 : i32
    %c0_i32_1 = arith.constant 0 : i32
    return %c0_i32, %c0_i32_0 : i32, i32
  }
  func.func @transform_9(%arg0: i32) -> (i32, i32) {
    %c0_i32 = arith.constant 0 : i32
    %c0_i32_0 = arith.constant 0 : i32
    return %arg0, %c0_i32 : i32, i32
  }
}

</mosaic_0001>

<bundles_post_ra>
// kernel: critic_forward.1
= control target key start
LH: loop header
LB: loop body
LE: loop exit
PB: predicated region body
PF: predicated region fallthrough
CT: control target
= control target key end

     0   :  { %14 = vsyncpa [#allocation3], 0  ;;  %s624_s0 = inlined_call_operand.hbm [shape: f32[8,16], index: 0, kind: input, shape index: {}]   ;;  %s625_s1 = inlined_call_operand.vmem [shape: f32[8,4], index: 1, kind: input, shape index: {}]   ;;  %s626_s2 = inlined_call_operand.vmem [shape: f32[16,128], index: 2, kind: input, shape index: {}]   ;;  %s627_s3 = inlined_call_operand.vmem [shape: f32[4,128], index: 3, kind: input, shape index: {}]   ;;  %s628_s4 = inlined_call_operand.vmem [shape: f32[1,128], index: 4, kind: input, shape index: {}]   ;;  %s629_s5 = inlined_call_operand.hbm [shape: f32[128,128], index: 5, kind: input, shape index: {}]   ;;  %s630_s6 = inlined_call_operand.vmem [shape: f32[1,128], index: 6, kind: input, shape index: {}]   ;;  %s631_s7 = inlined_call_operand.vmem [shape: f32[1,128], index: 7, kind: input, shape index: {}]   ;;  %s632_s8 = inlined_call_operand.hbm [shape: f32[1,2], index: 8, kind: input, shape index: {}]   ;;  %s633_s9 = inlined_call_operand.vmem [shape: f32[8,2], index: 9, kind: output, shape index: {}]  }
   0x1   :  { %15 = vsyncpa [#allocation5], 0  ;;  %s512_s30 = smov [#allocation4]  }
   0x2   :  { %s39_s10 = sshll.u32 %s512_s30, 4  ;;  %s40_s10 = int_to_ptr.vmem [resolvable:$true] %s39_s10 }
   0x3   :  { %s456_s11 = scalar_lea.vmem %s40_s10, 2048  ;;  %p461_p1 = scmp.lt.s32.totalorder %s40_s10, %s40_s10 }
   0x4   :  { %p457_p0 = scmp.ne.s32.totalorder %s40_s10, %s456_s11  ;;  %p462_p2 = scmp.lt.s32.totalorder %s456_s11, %s456_s11 }
   0x6   :  { %p463_p3 = por %p462_p2, %p461_p1 }
   0x8   :  { %p464_p4 = pnand %p463_p3, %p457_p0 }
   0xa   :  { %467 = shalt.err (!%p464_p4)
}
   0xb   :  { %s513_s12 = smov 128   ;;  %s514_s13 = smov 8  }
   0xc   :  { %45 = dma.hbm_to_vmem [thread:$0]  %s629_s5, 2048, %s40_s10, [#allocation5], %s513_s12, %s513_s12, %s514_s13  }
   0xd   :  { %s515_s16 = smov [#allocation2]   ;;  %s516_s18 = smov [#allocation6]  }
   0xe   :  { %s22_s17 = sshll.u32 %s515_s16, 4  ;;  %s56_s19 = sshll.u32 %s516_s18, 4  ;;  %s23_s17 = int_to_ptr.vmem [resolvable:$true] %s22_s17  ;;  %s57_s19 = int_to_ptr.vmem [resolvable:$true] %s56_s19 }
   0xf   :  { %s476_s20 = scalar_lea.vmem %s23_s17, 128  ;;  %p481_p6 = scmp.lt.s32.totalorder %s23_s17, %s23_s17 }
  0x10   :  { %p477_p5 = scmp.ne.s32.totalorder %s23_s17, %s476_s20  ;;  %p482_p7 = scmp.lt.s32.totalorder %s476_s20, %s476_s20 }
  0x12   :  { %p483_p8 = por %p482_p7, %p481_p6 }
  0x14   :  { %p484_p9 = pnand %p483_p8, %p477_p5 }
  0x16   :  { %487 = shalt.err (!%p484_p9)
}
  0x17   :  { %25 = dma.hbm_to_vmem [thread:$0]  %s624_s0, 128, %s23_s17, [#allocation3]  }
  0x18   :  { %s496_s23 = scalar_lea.vmem %s57_s19, 16  ;;  %s500_s5 = scalar_lea.vmem %s57_s19, 32 }
  0x19   :  { %p497_p10 = scmp.ne.s32.totalorder %s57_s19, %s496_s23  ;;  %p501_p11 = scmp.lt.s32.totalorder %s57_s19, %s57_s19 }
  0x1a   :  { %p502_p12 = scmp.lt.s32.totalorder %s500_s5, %s496_s23 }
  0x1c   :  { %p503_p13 = por %p502_p12, %p501_p11 }
  0x1e   :  { %p504_p0 = pnand %p503_p13, %p497_p10 }
  0x20   :  { %507 = shalt.err (!%p504_p0)
}
  0x21   :  { %59 = dma.hbm_to_vmem [thread:$0]  %s632_s8, 16, %s57_s19, [#allocation5]  }
  0x22   :  { %508 = dma.done.wait [#allocation3], 128  }
  0x23   :  { %509 = vsyncadd [#allocation3], 4294967168 }
  0x24   :  { %510 = dma.done.wait [#allocation5], 2064  }
  0x25   :  { %511 = vsyncadd [#allocation5], 4294965232  ;;  %v517_v0 = vmov 0.0   ;;  %vm518_vm0 = vmmov 0   ;;  %vm78_vm1 = vcmask 1043456   ;;  %vm74_vm2 = vcmask 31744  }
  0x26   :  { %394 = vmatprep.subr.mxu1 %v517_v0  ;;  %396 = vmatprep.mubr.msk.f32.mxu1 %vm518_vm0, %v517_v0  ;;  %v73_v1 = vld [vmem:[%s627_s3] sm:$0xf]  ;;  %v72_v3 = vld [vmem:[%s626_s2 + $0x8] sm:$0xff]  ;;  %vm152_vm3 = vcmask 130048   ;;  %v249_v7 = vld [vmem:[#allocation4 + $0x70] sm:$0xff]  ;;  %v337_v30 = vlaneseq  ;;  %vm347_vm6 = vcmask 7168  }
  0x27   :  { %406 = vmatprep.subr.mxu0 %v517_v0  ;;  %438 = vmatprep.mubr.msk.f32.mxu0 %vm518_vm0, %v517_v0  ;;  %v70_v2 = vld [vmem:[%s625_s1] sm:$0xff]  ;;  %v248_v8 = vld [vmem:[#allocation4 + $0x68] sm:$0xff]  ;;  %v247_v9 = vld [vmem:[#allocation4 + $0x60] sm:$0xff]  ;;  %vm357_vm7 = vcmask 15360  }
  0x28   :  { %395 = vmatpush3.msk.msra.mxu1 %vm78_vm1, %v73_v1  ;;  %v250_v4 = vld [vmem:[#allocation4 + $0x78] sm:$0xff]  ;;  %v245_v11 = vld [vmem:[#allocation4 + $0x50] sm:$0xff]  ;;  %v244_v12 = vld [vmem:[#allocation4 + $0x48] sm:$0xff]  ;;  %v338_v33 = vand.u32 127, %v337_v30 }
  0x29   :  { %397 = vmatmul.mubr.msk.f32.vlgmr.msra.gmra.mxu1 %vm74_vm2, %v70_v2  ;;  %399 = vmatprep.subr.mxu1 %v517_v0  ;;  %v71_v5 = vld [vmem:[%s626_s2] sm:$0xff]  ;;  %v243_v13 = vld [vmem:[#allocation4 + $0x40] sm:$0xff]  ;;  %v241_v15 = vld [vmem:[#allocation4 + $0x30] sm:$0xff] }
  0x2a   :  { %400 = vmatpush3.msra.mxu1 %v72_v3  ;;  %403 = vmatprep.mubr.msk.f32.mxu1 %vm518_vm0, %v517_v0  ;;  %v69_v6 = vld [vmem:[#allocation2] sm:$0xff]  ;;  %v240_v16 = vld [vmem:[#allocation4 + $0x28] sm:$0xff]  ;;  %v239_v17 = vld [vmem:[#allocation4 + $0x20] sm:$0xff]  ;;  %vm339_vm4 = vcmp.lt.s32.totalorder %v338_v33, 64  ;;  %vm343_vm5 = vcmp.ge.s32.totalorder %v338_v33, 64 }
  0x2b   :  { %401 = vmatprep.subr.mxu1 %v517_v0  ;;  %407 = vmatpush3.msra.mxu0 %v250_v4  ;;  %v246_v10 = vld [vmem:[#allocation4 + $0x58] sm:$0xff]  ;;  %v237_v19 = vld [vmem:[#allocation4 + $0x10] sm:$0xff]  ;;  %v236_v20 = vld [vmem:[#allocation4 + $0x8] sm:$0xff] }
  0x2c   :  { %402 = vmatpush3.msra.mxu1 %v71_v5  ;;  %408 = vmatprep.subr.mxu0 %v517_v0  ;;  %v242_v14 = vld [vmem:[#allocation4 + $0x38] sm:$0xff]  ;;  %v235_v21 = vld [vmem:[#allocation4] sm:$0xff] }
  0x2d   :  { %404 = vmatmul.mubr.msk.f32.vlgmr.msra.gmra.mxu1 %vm152_vm3, %v69_v6  ;;  %409 = vmatpush3.msra.mxu0 %v249_v7  ;;  %v238_v18 = vld [vmem:[#allocation4 + $0x18] sm:$0xff]  ;;  %v371_v42 = vld [vmem:[#allocation6] ss:$0 sm:$0xff] }
  0x2e   :  { %410 = vmatprep.subr.mxu0 %v517_v0  ;;  %v368_v25 = vld [vmem:[%s628_s4] ss:$0 sm:$0xff] }
  0x2f   :  { %411 = vmatpush3.msra.mxu0 %v248_v8  ;;  %v369_v31 = vld [vmem:[%s630_s6] ss:$0 sm:$0xff] }
  0x30   :  { %412 = vmatprep.subr.mxu0 %v517_v0  ;;  %v370_v36 = vld [vmem:[%s631_s7] ss:$0 sm:$0xff] }
  0x31   :  { %413 = vmatpush3.msra.mxu0 %v247_v9 }
  0x32   :  { %414 = vmatprep.subr.mxu0 %v517_v0 }
  0x33   :  { %415 = vmatpush3.msra.mxu0 %v246_v10 }
  0x34   :  { %416 = vmatprep.subr.mxu0 %v517_v0 }
  0x35   :  { %417 = vmatpush3.msra.mxu0 %v245_v11 }
  0x36   :  { %418 = vmatprep.subr.mxu0 %v517_v0 }
  0x37   :  { %419 = vmatpush3.msra.mxu0 %v244_v12 }
  0x38   :  { %420 = vmatprep.subr.mxu0 %v517_v0 }
  0x39   :  { %421 = vmatpush3.msra.mxu0 %v243_v13 }
  0x3a   :  { %422 = vmatprep.subr.mxu0 %v517_v0 }
  0x3b   :  { %423 = vmatpush3.msra.mxu0 %v242_v14 }
  0x3c   :  { %424 = vmatprep.subr.mxu0 %v517_v0 }
  0x3d   :  { %425 = vmatpush3.msra.mxu0 %v241_v15 }
  0x3e   :  { %426 = vmatprep.subr.mxu0 %v517_v0 }
  0x3f   :  { %427 = vmatpush3.msra.mxu0 %v240_v16 }
  0x40   :  { %428 = vmatprep.subr.mxu0 %v517_v0 }
  0x41   :  { %429 = vmatpush3.msra.mxu0 %v239_v17 }
  0x42   :  { %430 = vmatprep.subr.mxu0 %v517_v0 }
  0x43   :  { %431 = vmatpush3.msra.mxu0 %v238_v18 }
  0x44   :  { %432 = vmatprep.subr.mxu0 %v517_v0 }
  0x45   :  { %433 = vmatpush3.msra.mxu0 %v237_v19 }
  0x46   :  { %434 = vmatprep.subr.mxu0 %v517_v0 }
  0x47   :  { %435 = vmatpush3.msra.mxu0 %v236_v20 }
  0x48   :  { %436 = vmatprep.subr.mxu0 %v517_v0 }
  0x49   :  { %437 = vmatpush3.msra.mxu0 %v235_v21 }
  0xe9   :  { %v148_v22 = vpop.f32.mrf.mxu1 }
  0xeb   :  { %v398_v23 = vpop.f32.mrf.mxu1 }
  0xed   :  { %v222_v24 = vpop.f32.mrf.mxu1 }
  0xee   :  { %v223_v26 = vadd.f32 %v222_v24, %v148_v22 }
  0xef   :  { %v405_v27 = vpop.f32.mrf.mxu1 }
  0xf0   :  { %v233_v28 = vadd.f32 %v368_v25, %v223_v26 }
  0xf2   :  { %v234_v29 = vmax.f32 %v233_v28, 0.0 }
  0xf4   :  { %439 = vmatmul.mubr.f32.vlgmr.msra.gmra.mxu0 %v234_v29 }
 0x1b4   :  { %v324_v32 = vpop.f32.mrf.mxu0 }
 0x1b5   :  { %v325_v34 = vadd.f32 %v369_v31, %v324_v32 }
 0x1b6   :  { %v440_v35 = vpop.f32.mrf.mxu0 }
 0x1b7   :  { %v328_v37 = vmax.f32 %v325_v34, 0.0 }
 0x1b9   :  { %v336_v38 = vmul.f32 %v370_v36, %v328_v37 }
 0x1bb   :  { %v340_v39 = vsel %vm339_vm4, %v336_v38, 0.0  ;;  %v344_v40 = vsel %vm343_vm5, %v336_v38, 0.0 }
 0x1bc   :  { %341 = vadd.xlane.f32.xlu0 %v340_v39 }
 0x1c0   :  { %345 = vadd.xlane.f32.xlu0 %v344_v40 }
 0x245   :  { %v342_v41 = vpop.xlane.xlu0 %341 }
 0x249   :  { %v346_v43 = vpop.xlane.xlu0 %345 }
 0x24a   :  { %v348_v44 = vsel %vm347_vm6, %v342_v41, %v346_v43 }
 0x24b   :  { %v356_v45 = vadd.f32 %v371_v42, %v348_v44 }
 0x24d   :  { %358 = vst.msk [vmem:[%s633_s9] sm:$0xff] %vm357_vm7, %v356_v45 }
 0x24e   :  { %363 = vsyncpa [#allocation3], 1 }
 0x24f   :  { %364 = vsyncpa [#allocation5], 1 }

</bundles_post_ra>
